<compile_context>
chip_gen: v7x
topology: tpu7x:2x2x1
jax: 0.10.0
libtpu: 0.0.40
codegen_flags: <defaults>
</compile_context>

<pallas_src>
import jax
import jax.numpy as jnp
from jax.experimental import pallas as pl
from jax.experimental.pallas import tpu as pltpu


def _identity_kernel(x_ref, o_ref):
    # Hot path: element-wise copy of the current VMEM tile.
    o_ref[...] = x_ref[...]


_SMALL_BYTES = 2 * 1024 * 1024        # below this: whole-array single block
_TARGET_TILE_BYTES = 4 * 1024 * 1024  # ~4 MiB tiles for the gridded path
_VMEM_LIMIT_BYTES = 32 * 1024 * 1024  # explicit, safe on v5e/v6e/v7x


def _pick_lanes(n: int):
    """Widest lane count (multiple of 128) that divides n, or None."""
    for lanes in (2048, 1024, 512, 256, 128):
        if n % lanes == 0:
            return lanes
    return None


def _copy_whole(x: jax.Array) -> jax.Array:
    """Single whole-array block: no grid, full dims (exempt from (8,128))."""
    return pl.pallas_call(
        _identity_kernel,
        out_shape=jax.ShapeDtypeStruct(x.shape, x.dtype),
    )(x)


def _copy_tiled_2d(x2d: jax.Array) -> jax.Array:
    """Tiled copy of a lane-dense (rows, lanes) slab with ~4 MiB blocks."""
    rows, lanes = x2d.shape
    itemsize = jnp.dtype(x2d.dtype).itemsize
    tile_rows = max(8, _TARGET_TILE_BYTES // (lanes * itemsize))
    if tile_rows >= rows:
        tile_rows = rows                      # full dim -> single grid step
    else:
        tile_rows = (tile_rows // 8) * 8      # keep block sublane-aligned
    grid = (pl.cdiv(rows, tile_rows),)        # partial last block is masked

    return pl.pallas_call(
        _identity_kernel,
        out_shape=jax.ShapeDtypeStruct((rows, lanes), x2d.dtype),
        grid_spec=pltpu.PrefetchScalarGridSpec(
            num_scalar_prefetch=0,
            grid=grid,
            in_specs=[pl.BlockSpec((tile_rows, lanes), lambda i: (i, 0))],
            out_specs=pl.BlockSpec((tile_rows, lanes), lambda i: (i, 0)),
        ),
        compiler_params=pltpu.CompilerParams(
            dimension_semantics=("parallel",),   # lets v7x shard across 2 TCs
            vmem_limit_bytes=_VMEM_LIMIT_BYTES,
        ),
    )(x2d)


def identity(x: jax.Array) -> jax.Array:
    """Pallas identity: returns an array equal to x (same shape, same dtype)."""
    orig_shape = x.shape
    n = x.size
    if n == 0:
        return x
    if x.ndim == 0:
        return _copy_whole(x.reshape(1, 1)).reshape(orig_shape)

    itemsize = jnp.dtype(x.dtype).itemsize
    lanes = _pick_lanes(n)

    # Small arrays: one full-array block, no padding, no tail slice.  When the
    # flat size divides a lane width, present a lane-dense 2D view so the
    # output stores are unmasked.
    if n * itemsize <= _SMALL_BYTES:
        if lanes is not None:
            return _copy_whole(x.reshape(n // lanes, lanes)).reshape(orig_shape)
        return _copy_whole(x)

    # Large arrays: pure-metadata reshape to (rows, lanes) — no zero-pad, no
    # trailing slice — and a big-tile gridded copy.
    if lanes is not None:
        return _copy_tiled_2d(x.reshape(n // lanes, lanes)).reshape(orig_shape)

    # Rare fallback: large array whose element count is not a multiple of 128.
    # Pad at most 127 elements, tiled-copy, then slice the tail back off.
    x_flat = x.reshape(-1)
    n_pad = ((n + 127) // 128) * 128
    x_flat = jnp.concatenate([x_flat, jnp.zeros((n_pad - n,), dtype=x.dtype)])
    out2d = _copy_tiled_2d(x_flat.reshape(n_pad // 128, 128))
    return out2d.reshape(-1)[:n].reshape(orig_shape)


if __name__ == "__main__":
    key = jax.random.PRNGKey(0)

    # Small NCHW activation consistent with the PyTorch module's usage.
    x = jax.random.normal(key, (2, 4, 16, 16), dtype=jnp.float32)
    y = identity(x)
    jax.block_until_ready(y)
    assert y.shape == x.shape and y.dtype == x.dtype
    assert bool(jnp.array_equal(y, x))

    # Larger input to exercise the tiled (gridded) path as well.
    x_big = jax.random.normal(key, (16, 16, 64, 128), dtype=jnp.float32)
    y_big = identity(x_big)
    jax.block_until_ready(y_big)
    assert y_big.shape == x_big.shape and y_big.dtype == x_big.dtype
    assert bool(jnp.array_equal(y_big, x_big))

    print("KERNEL_OK")
</pallas_src>

<mosaic_0001>
module attributes {stable_mosaic.version = 11 : i64} {
  func.func @_identity_kernel(%arg0: memref<1x2048xf32, #tpu.memory_space<vmem>>, %arg1: memref<1x2048xf32, #tpu.memory_space<vmem>>) attributes {dimension_semantics = [], scalar_prefetch = 0 : i64, scratch_operands = 0 : i64, tpu.core_type = #tpu.core_type<tc>} {
    %c0 = arith.constant 0 : index
    %c0_0 = arith.constant 0 : index
    %0 = vector.load %arg0[%c0, %c0_0] : memref<1x2048xf32, #tpu.memory_space<vmem>>, vector<1x2048xf32>
    %c0_1 = arith.constant 0 : index
    %c0_2 = arith.constant 0 : index
    %1 = vector.load %arg1[%c0_1, %c0_2] : memref<1x2048xf32, #tpu.memory_space<vmem>>, vector<1x2048xf32>
    tpu.vector_store %arg1[%c0_1, %c0_2], %0 {strides = array<i32>} : memref<1x2048xf32, #tpu.memory_space<vmem>>, vector<1x2048xf32>,
    return
  }
}

</mosaic_0001>

<bundles_post_ra>
// kernel: tpu_custom_call.1
= control target key start
LH: loop header
LB: loop body
LE: loop exit
PB: predicated region body
PF: predicated region fallthrough
CT: control target
= control target key end

     0   :  { %6 = vsyncpa [#allocation3], 0  ;;  %s126_s0 = inlined_call_operand.hbm [shape: f32[1,2048], index: 0, kind: input, shape index: {}]   ;;  %s127_s1 = inlined_call_operand.hbm [shape: f32[1,2048], index: 1, kind: output, shape index: {}]  }
   0x1   :  { %7 = vsyncpa [#allocation4], 0  ;;  %s90_s6 = smov [#allocation2]   ;;  %s42_s10 = scalar_lea.hbm %s126_s0, 256 }
   0x2   :  { %s14_s7 = sshll.u32 %s90_s6, 4  ;;  %p43_p0 = scmp.ne.s32.totalorder %s126_s0, %s42_s10  ;;  %s15_s7 = int_to_ptr.vmem [resolvable:$true] %s14_s7 }
   0x3   :  { %p46_p1 = scmp.lt.u32.totalorder %s42_s10, %s126_s0 }
   0x5   :  { %p48_p2 = pnand %p46_p1, %p43_p0 }
   0x7   :  { %51 = shalt.err (!%p48_p2)
}
   0x8   :  { %s52_s15 = scalar_lea.vmem %s15_s7, 256  ;;  %p57_p4 = scmp.lt.s32.totalorder %s15_s7, %s15_s7 }
   0x9   :  { %p53_p3 = scmp.ne.s32.totalorder %s15_s7, %s52_s15  ;;  %p58_p5 = scmp.lt.s32.totalorder %s52_s15, %s52_s15 }
   0xb   :  { %p59_p6 = por %p58_p5, %p57_p4 }
   0xd   :  { %p60_p7 = pnand %p59_p6, %p53_p3 }
   0xf   :  { %63 = shalt.err (!%p60_p7)
}
  0x10   :  { %17 = dma.hbm_to_vmem [thread:$0]  %s126_s0, 256, %s15_s7, [#allocation3]  }
  0x11   :  { %86 = dma.done.wait [#allocation3], 256  }
  0x12   :  { %87 = vsyncadd [#allocation3], 4294967040  ;;  %s91_s18 = smov [#allocation5]   ;;  %v21_v0 = vld [vmem:[#allocation2] sm:$0xff]  ;;  %v22_v1 = vld [vmem:[#allocation2 + $0x8] sm:$0xff] }
  0x13   :  { %s31_s19 = sshll.u32 %s91_s18, 4  ;;  %23 = vst [vmem:[#allocation5] sm:$0xff] %v21_v0  ;;  %24 = vst [vmem:[#allocation5 + $0x8] sm:$0xff] %v22_v1  ;;  %s32_s19 = int_to_ptr.vmem [resolvable:$true] %s31_s19 }
  0x14   :  { %s64_s20 = scalar_lea.vmem %s32_s19, 256  ;;  %p69_p9 = scmp.lt.s32.totalorder %s32_s19, %s32_s19 }
  0x15   :  { %p65_p8 = scmp.ne.s32.totalorder %s32_s19, %s64_s20  ;;  %p70_p10 = scmp.lt.s32.totalorder %s64_s20, %s64_s20 }
  0x17   :  { %p71_p11 = por %p70_p10, %p69_p9 }
  0x19   :  { %p72_p12 = pnand %p71_p11, %p65_p8 }
  0x1b   :  { %75 = shalt.err (!%p72_p12)
}
  0x1c   :  { %s76_s0 = scalar_lea.hbm %s127_s1, 256 }
  0x1d   :  { %p77_p13 = scmp.ne.s32.totalorder %s127_s1, %s76_s0  ;;  %p80_p0 = scmp.lt.u32.totalorder %s76_s0, %s127_s1 }
  0x1f   :  { %p82_p1 = pnand %p80_p0, %p77_p13 }
  0x21   :  { %85 = shalt.err (!%p82_p1)
}
  0x22   :  { %34 = dma.vmem_to_hbm [thread:$0]  %s32_s19, 256, %s127_s1, [#allocation4]  }
  0x23   :  { %88 = dma.done.wait [#allocation4], 256  }
  0x24   :  { %89 = vsyncadd [#allocation4], 4294967040 }
  0x25   :  { %38 = vsyncpa [#allocation3], 1 }
  0x26   :  { %39 = vsyncpa [#allocation4], 1 }

</bundles_post_ra>
